<compile_context>
chip_gen: v7x
topology: tpu7x:2x2x1
jax: 0.10.0
libtpu: 0.0.40
codegen_flags: <defaults>
</compile_context>

<pallas_src>
import math

import jax
import jax.numpy as jnp
from jax.experimental import pallas as pl
from jax.experimental.pallas import tpu as pltpu


def _round_up(x: int, m: int) -> int:
    return ((x + m - 1) // m) * m


def _cdiv(a: int, b: int) -> int:
    return -(-a // b)


def _choose_tile(dim: int, cap: int, align: int):
    """Pick a tile <= cap (cap is a multiple of align) with balanced blocks.

    Returns (tile, padded_dim, num_blocks) with tile a multiple of `align`,
    padded_dim = tile * num_blocks >= dim, and per-block padding < align.
    """
    nblocks = max(1, _cdiv(dim, cap))
    tile = _round_up(_cdiv(dim, nblocks), align)
    return tile, tile * nblocks, nblocks


# ----------------------------- kernels ------------------------------------ #


def _matmul_bias_acc_kernel(x_ref, w_ref, b_ref, o_ref, acc_ref):
    """One (tm, tn) output tile; K axis (grid dim 2) is the reduction axis."""
    k = pl.program_id(2)

    @pl.when(k == 0)
    def _init():
        # Fold the fused bias into the accumulator init: saves a zero-fill
        # plus a separate (tm, tn) VPU add at finalize.
        acc_ref[...] = jnp.broadcast_to(b_ref[...], acc_ref.shape)

    acc_ref[...] += jnp.dot(
        x_ref[...], w_ref[...], preferred_element_type=jnp.float32
    )

    @pl.when(k == pl.num_programs(2) - 1)
    def _finalize():
        o_ref[...] = acc_ref[...].astype(o_ref.dtype)


def _matmul_bias_single_k_kernel(x_ref, w_ref, b_ref, o_ref):
    """Single K step: no scratch accumulator, write the tile directly."""
    o_ref[...] = (
        jnp.dot(x_ref[...], w_ref[...], preferred_element_type=jnp.float32)
        + b_ref[...]
    ).astype(o_ref.dtype)


# ----------------------------- wrappers ------------------------------------ #


def prepare_mirror_params(half_weight, half_weight_mirrored, bias,
                          *, compute_dtype=jnp.float32):
    """Fold the two mirrored weights into one K-major weight + fused bias.

    Cache/reuse the result across calls for inference — this is 2-3 full HBM
    passes over the weights that should not be repeated per forward call.
    """
    out_f, _ = half_weight.shape
    w1 = half_weight.astype(jnp.float32)
    w2 = half_weight_mirrored.astype(jnp.float32)
    w_sum_t = (w1 + w2).T.astype(compute_dtype)              # [in_f, out_f]
    bias32 = (jnp.zeros((out_f,), jnp.float32) if bias is None
              else bias.astype(jnp.float32))
    fused_bias = (bias32 + 0.5 * (w1.sum(axis=1) - w2.sum(axis=1))
                  ).reshape(1, out_f)                         # f32 always
    return w_sum_t, fused_bias


def mirror_with_gramo_forward_prepared(x, w_sum_t, fused_bias, *,
                                       out_dtype=None, weight_buffering=None):
    """x: [B, in_f]; w_sum_t: [in_f, out_f] (K-major); fused_bias: [1, out_f]
    f32. Returns [B, out_f] in out_dtype (defaults to x.dtype)."""
    B, K = x.shape
    Kw, N = w_sum_t.shape
    assert K == Kw, "x / weight in_features mismatch"

    compute_dtype = w_sum_t.dtype
    out_dtype = jnp.dtype(out_dtype) if out_dtype is not None else x.dtype
    itemsize = jnp.dtype(compute_dtype).itemsize
    out_itemsize = jnp.dtype(out_dtype).itemsize

    x_c = x.astype(compute_dtype)

    # --- tile caps first, then pad dims up to tile multiples --------------- #
    m_align = 8 if itemsize >= 4 else 16            # bf16 packs 16 sublanes
    tm, M_pad, m_blocks = _choose_tile(B, 512, m_align)
    tk, K_pad, k_blocks = _choose_tile(K, 1024, 128)
    tn, N_pad, n_blocks = _choose_tile(N, 1024, 128)

    # v7x has 2 TensorCores: make sure there are >=2 parallel blocks when the
    # grid would otherwise degenerate to (1, 1, k).
    if m_blocks == 1 and n_blocks == 1 and tn % 256 == 0:
        tn //= 2
        n_blocks = 2

    x_p = (x_c if (M_pad == B and K_pad == K)
           else jnp.pad(x_c, ((0, M_pad - B), (0, K_pad - K))))
    w_p = (w_sum_t if (K_pad == K and N_pad == N)
           else jnp.pad(w_sum_t, ((0, K_pad - K), (0, N_pad - N))))
    b_p = (fused_bias if N_pad == N
           else jnp.pad(fused_bias, ((0, 0), (0, N_pad - N))))

    multi_k = k_blocks > 1

    # --- VMEM budget: actual double-buffered working set + headroom -------- #
    vmem_bytes = (2 * (tm * tk + tk * tn) * itemsize   # double-buffered inputs
                  + 2 * tn * 4                          # bias tiles (f32)
                  + 2 * tm * tn * out_itemsize          # double-buffered output
                  + (tm * tn * 4 if multi_k else 0))    # f32 accumulator
    # >=32 MiB (above v5e's 16 MiB default scoped limit), <=48 MiB (safe on
    # v7x's 64 MiB physical VMEM).
    vmem_limit = int(min(max(vmem_bytes + (8 << 20), 32 << 20), 48 << 20))

    cost = pl.CostEstimate(
        flops=2 * M_pad * N_pad * K_pad,
        transcendentals=0,
        bytes_accessed=(M_pad * K_pad * itemsize
                        + K_pad * N_pad * itemsize * m_blocks  # re-streamed per M block
                        + N_pad * 4
                        + M_pad * N_pad * out_itemsize),
    )

    # Optional deeper prefetch on the weight stream (sweep 2 vs 3 if profiling
    # shows exposed weight DMA). Default leaves pipeline depth untouched.
    w_spec_kwargs = {}
    if weight_buffering is not None and weight_buffering != 2:
        w_spec_kwargs = dict(pipeline_mode=pl.Buffered(weight_buffering))

    if multi_k:
        grid = (m_blocks, n_blocks, k_blocks)
        in_specs = [
            pl.BlockSpec((tm, tk), lambda i, j, k: (i, k)),                 # x
            pl.BlockSpec((tk, tn), lambda i, j, k: (k, j), **w_spec_kwargs),  # W_sum^T
            pl.BlockSpec((1, tn), lambda i, j, k: (0, j)),                  # fused bias
        ]
        out_specs = pl.BlockSpec((tm, tn), lambda i, j, k: (i, j))
        scratch_shapes = [pltpu.VMEM((tm, tn), jnp.float32)]
        kernel = _matmul_bias_acc_kernel
        dim_sem = ("parallel", "parallel", "arbitrary")
    else:
        grid = (m_blocks, n_blocks)
        in_specs = [
            pl.BlockSpec((tm, tk), lambda i, j: (i, 0)),
            pl.BlockSpec((tk, tn), lambda i, j: (0, j), **w_spec_kwargs),
            pl.BlockSpec((1, tn), lambda i, j: (0, j)),
        ]
        out_specs = pl.BlockSpec((tm, tn), lambda i, j: (i, j))
        scratch_shapes = []
        kernel = _matmul_bias_single_k_kernel
        dim_sem = ("parallel", "parallel")

    out_p = pl.pallas_call(
        kernel,
        out_shape=jax.ShapeDtypeStruct((M_pad, N_pad), out_dtype),
        grid_spec=pltpu.PrefetchScalarGridSpec(
            num_scalar_prefetch=0,
            grid=grid,
            in_specs=in_specs,
            out_specs=out_specs,
            scratch_shapes=scratch_shapes,
        ),
        compiler_params=pltpu.CompilerParams(
            dimension_semantics=dim_sem,
            vmem_limit_bytes=vmem_limit,
        ),
        cost_estimate=cost,
    )(x_p, w_p, b_p)

    return out_p[:B, :N]


def mirror_with_gramo_forward(x, half_weight, half_weight_mirrored, bias=None, *,
                              compute_dtype=jnp.float32, out_dtype=None,
                              weight_buffering=None):
    """Convenience one-shot forward. For repeated inference calls, cache the
    result of prepare_mirror_params() and call *_forward_prepared directly."""
    w_sum_t, fused_bias = prepare_mirror_params(
        half_weight, half_weight_mirrored, bias, compute_dtype=compute_dtype)
    return mirror_with_gramo_forward_prepared(
        x, w_sum_t, fused_bias, out_dtype=out_dtype,
        weight_buffering=weight_buffering)


# ------------------------------- test -------------------------------------- #


if __name__ == "__main__":
    key = jax.random.PRNGKey(0)

    # (batch, in_features, out_features, compute_dtype, atol, rtol)
    # - small unaligned case (pads to 8 x 128)
    # - aligned single-K-step case (no scratch accumulator path)
    # - K > 1024 case -> exercises multi-K accumulator path
    # - opt-in bf16 compute path with a looser tolerance
    test_cases = [
        (2, 48, 24, jnp.float32, 1e-4, 1e-4),
        (16, 256, 128, jnp.float32, 1e-4, 1e-4),
        (8, 1152, 384, jnp.float32, 1e-4, 1e-4),
        (16, 256, 128, jnp.bfloat16, 5e-2, 5e-2),
    ]

    all_ok = True
    for batch, in_f, out_f, cdt, atol, rtol in test_cases:
        k_x, k_w, k_m, k_b, key = jax.random.split(key, 5)
        bound = 1.0 / math.sqrt(in_f)

        x = jax.random.normal(k_x, (batch, in_f), jnp.float32)
        half_weight = jax.random.uniform(
            k_w, (out_f, in_f), jnp.float32, minval=-bound, maxval=bound
        )
        # Perturb the mirrored copy so the folded +/-0.5 correction is
        # exercised (the module starts with W2 == W1 but they diverge).
        half_weight_mirrored = half_weight + 0.01 * jax.random.normal(
            k_m, (out_f, in_f), jnp.float32
        )
        bias = jax.random.uniform(
            k_b, (out_f,), jnp.float32, minval=-bound, maxval=bound
        )

        out = mirror_with_gramo_forward(
            x, half_weight, half_weight_mirrored, bias,
            compute_dtype=cdt, out_dtype=jnp.float32,
        )
        out = jax.block_until_ready(out)

        # Plain-JAX reference of the original two-matmul formulation.
        ref = (
            (x + 0.5) @ half_weight.T
            + (x - 0.5) @ half_weight_mirrored.T
            + bias[None, :]
        )
        ok = out.shape == (batch, out_f) and bool(
            jnp.allclose(out, ref, atol=atol, rtol=rtol)
        )
        all_ok = all_ok and ok

    if all_ok:
        print("KERNEL_OK")
    else:
        print("KERNEL_MISMATCH")
</pallas_src>

<mosaic_0001>
module attributes {stable_mosaic.version = 11 : i64} {
  func.func @_matmul_bias_single_k_kernel(%arg0: i32, %arg1: i32, %arg2: memref<8x128xf32, #tpu.memory_space<vmem>>, %arg3: memref<128x128xf32, #tpu.memory_space<vmem>>, %arg4: memref<1x128xf32, #tpu.memory_space<vmem>>, %arg5: memref<8x128xf32, #tpu.memory_space<vmem>>) attributes {dimension_semantics = [#tpu.dimension_semantics<parallel>, #tpu.dimension_semantics<parallel>], iteration_bounds = array<i64: 1, 1>, scalar_prefetch = 0 : i64, scratch_operands = 0 : i64, tpu.core_type = #tpu.core_type<tc>, window_params = [{transform_indices = @transform_0, window_bounds = array<i64: 8, 128>}, {transform_indices = @transform_1, window_bounds = array<i64: 128, 128>}, {transform_indices = @transform_2, window_bounds = array<i64: 1, 128>}, {transform_indices = @transform_3, window_bounds = array<i64: 8, 128>}]} {
    %c0 = arith.constant 0 : index
    %c0_0 = arith.constant 0 : index
    %0 = vector.load %arg2[%c0, %c0_0] : memref<8x128xf32, #tpu.memory_space<vmem>>, vector<8x128xf32>
    %c0_1 = arith.constant 0 : index
    %c0_2 = arith.constant 0 : index
    %1 = vector.load %arg3[%c0_1, %c0_2] : memref<128x128xf32, #tpu.memory_space<vmem>>, vector<128x128xf32>
    %cst = arith.constant dense<0.000000e+00> : vector<8x128xf32>
    %2 = tpu.matmul %0, %1, %cst {dimension_numbers = #tpu.dot_dimension_numbers<[1], [0], [0], [1], [0, 0, 1, 1], [], []>} : vector<8x128xf32>, vector<128x128xf32>, vector<8x128xf32> -> vector<8x128xf32>
    %c0_3 = arith.constant 0 : index
    %c0_4 = arith.constant 0 : index
    %3 = vector.load %arg4[%c0_3, %c0_4] : memref<1x128xf32, #tpu.memory_space<vmem>>, vector<1x128xf32>
    %4 = vector.broadcast %3 : vector<1x128xf32> to vector<8x128xf32>
    %5 = arith.addf %2, %4 : vector<8x128xf32>
    %c0_5 = arith.constant 0 : index
    %c0_6 = arith.constant 0 : index
    %6 = vector.load %arg5[%c0_5, %c0_6] : memref<8x128xf32, #tpu.memory_space<vmem>>, vector<8x128xf32>
    tpu.vector_store %arg5[%c0_5, %c0_6], %5 {strides = array<i32>} : memref<8x128xf32, #tpu.memory_space<vmem>>, vector<8x128xf32>,
    return
  }
  func.func @transform_0(%arg0: i32, %arg1: i32) -> (i32, i32) {
    %c0_i32 = arith.constant 0 : i32
    %c0_i32_0 = arith.constant 0 : i32
    return %arg0, %c0_i32 : i32, i32
  }
  func.func @transform_1(%arg0: i32, %arg1: i32) -> (i32, i32) {
    %c0_i32 = arith.constant 0 : i32
    %c0_i32_0 = arith.constant 0 : i32
    return %c0_i32, %arg1 : i32, i32
  }
  func.func @transform_2(%arg0: i32, %arg1: i32) -> (i32, i32) {
    %c0_i32 = arith.constant 0 : i32
    %c0_i32_0 = arith.constant 0 : i32
    return %c0_i32, %arg1 : i32, i32
  }
  func.func @transform_3(%arg0: i32, %arg1: i32) -> (i32, i32) {
    %c0_i32 = arith.constant 0 : i32
    return %arg0, %arg1 : i32, i32
  }
}

</mosaic_0001>

<bundles_post_ra>
// kernel: tpu_custom_call.1
= control target key start
LH: loop header
LB: loop body
LE: loop exit
PB: predicated region body
PF: predicated region fallthrough
CT: control target
= control target key end

     0   :  { %8 = vsyncpa [#allocation3], 0  ;;  %s383_s0 = inlined_call_operand.hbm [shape: f32[8,128], index: 0, kind: input, shape index: {}]   ;;  %s384_s1 = inlined_call_operand.hbm [shape: f32[128,128], index: 1, kind: input, shape index: {}]   ;;  %s385_s2 = inlined_call_operand.vmem [shape: f32[1,128], index: 2, kind: input, shape index: {}]   ;;  %s386_s3 = inlined_call_operand.hbm [shape: f32[8,128], index: 3, kind: output, shape index: {}]  }
   0x1   :  { %9 = vsyncpa [#allocation6], 0 }
   0x2   :  { %10 = vsyncpa [#allocation4], 0  ;;  %s309_s12 = smov [#allocation2]   ;;  %s310_s14 = smov [#allocation5]  }
   0x3   :  { %s17_s13 = sshll.u32 %s309_s12, 4  ;;  %s26_s15 = sshll.u32 %s310_s14, 4  ;;  %s18_s13 = int_to_ptr.vmem [resolvable:$true] %s17_s13  ;;  %s337_s15 = int_to_ptr.vmem [resolvable:$true] %s26_s15 }
   0x4   :  { %s237_s18 = scalar_lea.hbm %s383_s0, 128 }
   0x5   :  { %p238_p0 = scmp.ne.s32.totalorder %s383_s0, %s237_s18  ;;  %p241_p1 = scmp.lt.u32.totalorder %s237_s18, %s383_s0 }
   0x7   :  { %p243_p2 = pnand %p241_p1, %p238_p0 }
   0x9   :  { %246 = shalt.err (!%p243_p2)
}
   0xa   :  { %s247_s23 = scalar_lea.vmem %s18_s13, 128  ;;  %p252_p4 = scmp.lt.s32.totalorder %s18_s13, %s18_s13 }
   0xb   :  { %p248_p3 = scmp.ne.s32.totalorder %s18_s13, %s247_s23  ;;  %p253_p5 = scmp.lt.s32.totalorder %s247_s23, %s247_s23 }
   0xd   :  { %p254_p6 = por %p253_p5, %p252_p4 }
   0xf   :  { %p255_p7 = pnand %p254_p6, %p248_p3 }
  0x11   :  { %258 = shalt.err (!%p255_p7)
}
  0x12   :  { %20 = dma.hbm_to_vmem [thread:$0]  %s383_s0, 128, %s18_s13, [#allocation3]  }
  0x13   :  { %s259_s28 = scalar_lea.hbm %s384_s1, 2048 }
  0x14   :  { %p260_p8 = scmp.ne.s32.totalorder %s384_s1, %s259_s28  ;;  %p263_p9 = scmp.lt.u32.totalorder %s259_s28, %s384_s1 }
  0x16   :  { %p265_p10 = pnand %p263_p9, %p260_p8 }
  0x18   :  { %268 = shalt.err (!%p265_p10)
}
  0x19   :  { %s269_s6 = scalar_lea.vmem %s337_s15, 2048  ;;  %p274_p12 = scmp.lt.s32.totalorder %s337_s15, %s337_s15 }
  0x1a   :  { %p270_p11 = scmp.ne.s32.totalorder %s337_s15, %s269_s6  ;;  %p275_p13 = scmp.lt.s32.totalorder %s269_s6, %s269_s6 }
  0x1c   :  { %p276_p0 = por %p275_p13, %p274_p12 }
  0x1e   :  { %p277_p1 = pnand %p276_p0, %p270_p11 }
  0x20   :  { %280 = shalt.err (!%p277_p1)
}
  0x21   :  { %s311_s0 = smov 128   ;;  %s312_s7 = smov 8  }
  0x22   :  { %32 = dma.hbm_to_vmem [thread:$0]  %s384_s1, 2048, %s337_s15, [#allocation6], %s311_s0, %s311_s0, %s312_s7  }
  0x23   :  { %303 = dma.done.wait [#allocation3], 128  }
  0x24   :  { %304 = vsyncadd [#allocation3], 4294967168 }
  0x25   :  { %305 = dma.done.wait [#allocation6], 2048  }
  0x26   :  { %306 = vsyncadd [#allocation6], 4294965248  ;;  %v313_v0 = vmov 0.0|0.0   ;;  %vm314_vm0 = vmmov 0   ;;  %v315_v1 = vmov 0.0   ;;  %v42_v2 = vld [vmem:[#allocation5] sm:$0xff] }
  0x27   :  { %205 = vmatprep.subr.bf16.mxu0 %v313_v0  ;;  %202 = vmatprep.mubr.msk.f32.mxu0 %vm314_vm0, %v315_v1  ;;  %v43_v3 = vld [vmem:[#allocation5 + $0x8] sm:$0xff]  ;;  %v44_v4 = vld [vmem:[#allocation5 + $0x10] sm:$0xff]  ;;  %v45_v6 = vld [vmem:[#allocation5 + $0x18] sm:$0xff]  ;;  %s316_s11 = smov [#allocation7]  }
  0x28   :  { %v206_v5 = vpack.c.bf16 %v43_v3, %v42_v2  ;;  %v209_v7 = vpack.c.bf16 %v45_v6, %v44_v4  ;;  %v46_v8 = vld [vmem:[#allocation5 + $0x20] sm:$0xff]  ;;  %v47_v9 = vld [vmem:[#allocation5 + $0x28] sm:$0xff]  ;;  %v48_v11 = vld [vmem:[#allocation5 + $0x30] sm:$0xff]  ;;  %s142_s12 = sshll.u32 %s316_s11, 4  ;;  %s143_s12 = int_to_ptr.vmem [resolvable:$true] %s142_s12 }
  0x29   :  { %v212_v10 = vpack.c.bf16 %v47_v9, %v46_v8  ;;  %v49_v12 = vld [vmem:[#allocation5 + $0x38] sm:$0xff]  ;;  %v50_v14 = vld [vmem:[#allocation5 + $0x40] sm:$0xff]  ;;  %v51_v15 = vld [vmem:[#allocation5 + $0x48] sm:$0xff]  ;;  %s281_s13 = scalar_lea.vmem %s143_s12, 128  ;;  %p286_p3 = scmp.lt.s32.totalorder %s143_s12, %s143_s12 }
  0x2a   :  { %207 = vmatpush3.bf16.msra.mxu0 %v206_v5  ;;  %v215_v13 = vpack.c.bf16 %v49_v12, %v48_v11  ;;  %v218_v16 = vpack.c.bf16 %v51_v15, %v50_v14  ;;  %v52_v17 = vld [vmem:[#allocation5 + $0x50] sm:$0xff]  ;;  %v53_v18 = vld [vmem:[#allocation5 + $0x58] sm:$0xff]  ;;  %v54_v20 = vld [vmem:[#allocation5 + $0x60] sm:$0xff]  ;;  %p282_p2 = scmp.ne.s32.totalorder %s143_s12, %s281_s13  ;;  %p287_p4 = scmp.lt.s32.totalorder %s281_s13, %s281_s13 }
  0x2b   :  { %208 = vmatprep.subr.bf16.mxu0 %v313_v0  ;;  %v221_v19 = vpack.c.bf16 %v53_v18, %v52_v17  ;;  %v55_v21 = vld [vmem:[#allocation5 + $0x68] sm:$0xff]  ;;  %v56_v23 = vld [vmem:[#allocation5 + $0x70] sm:$0xff]  ;;  %v57_v24 = vld [vmem:[#allocation5 + $0x78] sm:$0xff] }
  0x2c   :  { %v224_v22 = vpack.c.bf16 %v55_v21, %v54_v20  ;;  %v227_v25 = vpack.c.bf16 %v57_v24, %v56_v23  ;;  %v41_v26 = vld [vmem:[#allocation2] sm:$0xff]  ;;  %p288_p5 = por %p287_p4, %p286_p3 }
  0x2d   :  { %v152_v27 = vld [vmem:[%s385_s2] ss:$0 sm:$0xff] }
  0x2e   :  { %210 = vmatpush3.bf16.msra.mxu0 %v209_v7  ;;  %p289_p6 = pnand %p288_p5, %p282_p2 }
  0x2f   :  { %211 = vmatprep.subr.bf16.mxu0 %v313_v0 }
  0x32   :  { %213 = vmatpush3.bf16.msra.mxu0 %v212_v10 }
  0x33   :  { %214 = vmatprep.subr.bf16.mxu0 %v313_v0 }
  0x36   :  { %216 = vmatpush3.bf16.msra.mxu0 %v215_v13 }
  0x37   :  { %217 = vmatprep.subr.bf16.mxu0 %v313_v0 }
  0x3a   :  { %219 = vmatpush3.bf16.msra.mxu0 %v218_v16 }
  0x3b   :  { %220 = vmatprep.subr.bf16.mxu0 %v313_v0 }
  0x3e   :  { %222 = vmatpush3.bf16.msra.mxu0 %v221_v19 }
  0x3f   :  { %223 = vmatprep.subr.bf16.mxu0 %v313_v0 }
  0x42   :  { %225 = vmatpush3.bf16.msra.mxu0 %v224_v22 }
  0x43   :  { %226 = vmatprep.subr.bf16.mxu0 %v313_v0 }
  0x46   :  { %228 = vmatpush3.bf16.msra.mxu0 %v227_v25 }
  0x49   :  { %203 = vmatmul.mubr.f32.vlgmr.msra.gmra.mrb[0].mxu0 %v41_v26 }
 0x11c   :  { %v131_v28 = vpop.f32.mrb[0].mxu0 }
 0x11d   :  { %v132_v29 = vadd.f32 %v152_v27, %v131_v28  ;;  %v204_v30 = vpop.f32.mrb[1].mxu0 }
 0x11f   :  { %135 = vst [vmem:[#allocation7] sm:$0xff] %v132_v29 }
 0x120   :  { %292 = shalt.err (!%p289_p6)
}
 0x121   :  { %s293_s16 = scalar_lea.hbm %s386_s3, 128 }
 0x122   :  { %p294_p7 = scmp.ne.s32.totalorder %s386_s3, %s293_s16  ;;  %p297_p8 = scmp.lt.u32.totalorder %s293_s16, %s386_s3 }
 0x124   :  { %p299_p9 = pnand %p297_p8, %p294_p7 }
 0x126   :  { %302 = shalt.err (!%p299_p9)
}
 0x127   :  { %145 = dma.vmem_to_hbm [thread:$0]  %s143_s12, 128, %s386_s3, [#allocation4]  }
 0x128   :  { %307 = dma.done.wait [#allocation4], 128  }
 0x129   :  { %308 = vsyncadd [#allocation4], 4294967168 }
 0x12a   :  { %149 = vsyncpa [#allocation3], 1 }
 0x12b   :  { %150 = vsyncpa [#allocation6], 1 }
 0x12c   :  { %151 = vsyncpa [#allocation4], 1 }

</bundles_post_ra>
